<compile_context>
chip_gen: v7x
topology: tpu7x:2x2x1
jax: 0.10.0
libtpu: 0.0.40
codegen_flags: <defaults>
</compile_context>

<pallas_src>
import jax
import jax.numpy as jnp
import numpy as np
from jax.experimental import pallas as pl
from jax.experimental.pallas import tpu as pltpu

KH, KW = 3, 3  # kernel_size=(3,3), stride=(1,1), padding='same' -> pad 1


def fused_conv_actnorm_kernel(w_ref, p_ref, o_ref):
    # w_ref: (Cout, KH*KW*Cin)   transposed conv weight
    # p_ref: (KH*KW*Cin, B*H*W)  transposed im2col patches
    # o_ref: (Cout, B*H*W)       channel-major, lane-dense output
    y = jnp.dot(w_ref[...], p_ref[...], preferred_element_type=jnp.float32)

    # ActNorm2d data-dependent init + apply (scale=1.0); reduction over B,H,W
    # == reduction over the lane axis of the channel-major (Cout, B*H*W) tile.
    mean = jnp.mean(y, axis=1, keepdims=True)                 # bias = -mean
    centered = y - mean                                       # y + bias
    var = jnp.mean(centered * centered, axis=1, keepdims=True)
    inv_std = 1.0 / (jnp.sqrt(var) + 1e-6)                    # == exp(log(scale/(sqrt(var)+eps)))
    o_ref[...] = (centered * inv_std).astype(o_ref.dtype)


def conv2d_forward(x_nchw, weight_oihw):
    """Conv2d(3x3, 'same', bias=None) + ActNorm2d(init+apply).

    x_nchw: (B, Cin, H, W) float32;  weight_oihw: (Cout, Cin, 3, 3) float32.
    Returns (B, Cout, H, W) float32 (PyTorch layout).
    """
    B, Cin, H, W = x_nchw.shape
    Cout = weight_oihw.shape[0]
    M = B * H * W          # 512 here -> lane-dense (multiple of 128)
    K = KH * KW * Cin      # 36

    # ---- wrapper-side im2col (XLA), feature order (kh, kw, ci) ----
    x_nhwc = jnp.transpose(x_nchw, (0, 2, 3, 1))                      # (B,H,W,Cin)
    x_pad = jnp.pad(x_nhwc, ((0, 0), (1, 1), (1, 1), (0, 0)))
    taps = [x_pad[:, kh:kh + H, kw:kw + W, :]
            for kh in range(KH) for kw in range(KW)]                  # 9 x (B,H,W,Cin)
    patches_t = jnp.concatenate(taps, axis=-1).reshape(M, K).T        # (K, M)
    # (Cout,Cin,KH,KW) -> (Cout, KH*KW*Cin), matching the (kh,kw,ci) feature order.
    w_t = jnp.transpose(weight_oihw, (0, 2, 3, 1)).reshape(Cout, K)   # (Cout, K)

    y = pl.pallas_call(
        fused_conv_actnorm_kernel,
        out_shape=jax.ShapeDtypeStruct((Cout, M), jnp.float32),
        grid_spec=pltpu.PrefetchScalarGridSpec(
            num_scalar_prefetch=0,
            grid=(1,),
            in_specs=[
                pl.BlockSpec((Cout, K), lambda i: (0, 0)),
                pl.BlockSpec((K, M), lambda i: (0, 0)),
            ],
            out_specs=pl.BlockSpec((Cout, M), lambda i: (0, 0)),
        ),
        compiler_params=pltpu.CompilerParams(
            dimension_semantics=("arbitrary",)),
    )(w_t, patches_t)

    # (Cout, B*H*W) -> (B, Cout, H, W)
    return jnp.transpose(y.reshape(Cout, B, H, W), (1, 0, 2, 3))


def _reference(x_nchw, weight_oihw):
    # Pure-JAX reference (conv + actnorm init/apply), PyTorch layout conventions.
    y = jax.lax.conv_general_dilated(
        x_nchw, weight_oihw, window_strides=(1, 1), padding=((1, 1), (1, 1)),
        dimension_numbers=("NCHW", "OIHW", "NCHW"))
    mean = jnp.mean(y, axis=(0, 2, 3), keepdims=True)
    centered = y - mean
    var = jnp.mean(centered ** 2, axis=(0, 2, 3), keepdims=True)
    logs = jnp.log(1.0 / (jnp.sqrt(var) + 1e-6))
    return centered * jnp.exp(logs)


if __name__ == "__main__":
    key = jax.random.PRNGKey(0)
    kx, kw = jax.random.split(key)

    B, Cin, Cout, H, W = 2, 4, 8, 16, 16
    x = jax.random.normal(kx, (B, Cin, H, W), dtype=jnp.float32)
    # conv.weight ~ Normal(0, 0.05), shape (Cout, Cin, 3, 3); no conv bias (do_actnorm=True).
    weight = 0.05 * jax.random.normal(kw, (Cout, Cin, KH, KW), dtype=jnp.float32)

    out = conv2d_forward(x, weight)
    out = jax.block_until_ready(out)

    ref = _reference(x, weight)
    np.testing.assert_allclose(np.asarray(out), np.asarray(ref), rtol=1e-3, atol=1e-3)

    print("KERNEL_OK")
</pallas_src>

<mosaic_0001>
module attributes {stable_mosaic.version = 11 : i64} {
  func.func @fused_conv_actnorm_kernel(%arg0: i32, %arg1: memref<8x36xf32, #tpu.memory_space<vmem>>, %arg2: memref<36x512xf32, #tpu.memory_space<vmem>>, %arg3: memref<8x512xf32, #tpu.memory_space<vmem>>) attributes {dimension_semantics = [#tpu.dimension_semantics<arbitrary>], iteration_bounds = array<i64: 1>, scalar_prefetch = 0 : i64, scratch_operands = 0 : i64, tpu.core_type = #tpu.core_type<tc>, window_params = [{pipeline_mode = #tpu.pipeline_mode<synchronous>, transform_indices = @transform_0, window_bounds = array<i64: 8, 36>}, {pipeline_mode = #tpu.pipeline_mode<synchronous>, transform_indices = @transform_1, window_bounds = array<i64: 36, 512>}, {pipeline_mode = #tpu.pipeline_mode<synchronous>, transform_indices = @transform_2, window_bounds = array<i64: 8, 512>}]} {
    %c0 = arith.constant 0 : index
    %c0_0 = arith.constant 0 : index
    %0 = vector.load %arg1[%c0, %c0_0] : memref<8x36xf32, #tpu.memory_space<vmem>>, vector<8x36xf32>
    %c0_1 = arith.constant 0 : index
    %c0_2 = arith.constant 0 : index
    %1 = vector.load %arg2[%c0_1, %c0_2] : memref<36x512xf32, #tpu.memory_space<vmem>>, vector<36x512xf32>
    %cst = arith.constant dense<0.000000e+00> : vector<8x512xf32>
    %2 = tpu.matmul %0, %1, %cst {dimension_numbers = #tpu.dot_dimension_numbers<[1], [0], [0], [1], [0, 0, 1, 1], [], []>} : vector<8x36xf32>, vector<36x512xf32>, vector<8x512xf32> -> vector<8x512xf32>
    %cst_3 = arith.constant dense<0.000000e+00> : vector<8xf32>
    %3 = vector.multi_reduction <add>, %2, %cst_3 [1] : vector<8x512xf32> to vector<8xf32>
    %4 = vector.shape_cast %3 : vector<8xf32> to vector<8x1xf32>
    %cst_4 = arith.constant 5.120000e+02 : f32
    %5 = vector.broadcast %cst_4 : f32 to vector<8x1xf32>
    %6 = arith.divf %4, %5 : vector<8x1xf32>
    %7 = vector.broadcast %6 : vector<8x1xf32> to vector<8x512xf32>
    %8 = arith.subf %2, %7 : vector<8x512xf32>
    %9 = arith.mulf %8, %8 : vector<8x512xf32>
    %cst_5 = arith.constant dense<0.000000e+00> : vector<8xf32>
    %10 = vector.multi_reduction <add>, %9, %cst_5 [1] : vector<8x512xf32> to vector<8xf32>
    %11 = vector.shape_cast %10 : vector<8xf32> to vector<8x1xf32>
    %cst_6 = arith.constant 5.120000e+02 : f32
    %12 = vector.broadcast %cst_6 : f32 to vector<8x1xf32>
    %13 = arith.divf %11, %12 : vector<8x1xf32>
    %14 = math.sqrt %13 : vector<8x1xf32>
    %cst_7 = arith.constant 9.99999997E-7 : f32
    %15 = vector.broadcast %cst_7 : f32 to vector<8x1xf32>
    %16 = arith.addf %14, %15 : vector<8x1xf32>
    %cst_8 = arith.constant 1.000000e+00 : f32
    %17 = vector.broadcast %cst_8 : f32 to vector<8x1xf32>
    %18 = arith.divf %17, %16 : vector<8x1xf32>
    %19 = vector.broadcast %18 : vector<8x1xf32> to vector<8x512xf32>
    %20 = arith.mulf %8, %19 : vector<8x512xf32>
    %c0_9 = arith.constant 0 : index
    %c0_10 = arith.constant 0 : index
    %21 = vector.load %arg3[%c0_9, %c0_10] : memref<8x512xf32, #tpu.memory_space<vmem>>, vector<8x512xf32>
    tpu.vector_store %arg3[%c0_9, %c0_10], %20 {strides = array<i32>} : memref<8x512xf32, #tpu.memory_space<vmem>>, vector<8x512xf32>,
    return
  }
  func.func @transform_0(%arg0: i32) -> (i32, i32) {
    %c0_i32 = arith.constant 0 : i32
    %c0_i32_0 = arith.constant 0 : i32
    %c0_i32_1 = arith.constant 0 : i32
    return %c0_i32, %c0_i32_0 : i32, i32
  }
  func.func @transform_1(%arg0: i32) -> (i32, i32) {
    %c0_i32 = arith.constant 0 : i32
    %c0_i32_0 = arith.constant 0 : i32
    %c0_i32_1 = arith.constant 0 : i32
    return %c0_i32, %c0_i32_0 : i32, i32
  }
  func.func @transform_2(%arg0: i32) -> (i32, i32) {
    %c0_i32 = arith.constant 0 : i32
    %c0_i32_0 = arith.constant 0 : i32
    %c0_i32_1 = arith.constant 0 : i32
    return %c0_i32, %c0_i32_0 : i32, i32
  }
}

</mosaic_0001>

<bundles_post_ra>
// kernel: tpu_custom_call.1
= control target key start
LH: loop header
LB: loop body
LE: loop exit
PB: predicated region body
PF: predicated region fallthrough
CT: control target
= control target key end

     0   :  { %7 = vsyncpa [#allocation3], 0  ;;  %s441_s0 = inlined_call_operand.hbm [shape: f32[8,36], index: 0, kind: input, shape index: {}]   ;;  %s442_s1 = inlined_call_operand.hbm [shape: f32[36,512], index: 1, kind: input, shape index: {}]   ;;  %s443_s2 = inlined_call_operand.hbm [shape: f32[8,512], index: 2, kind: output, shape index: {}]  }
   0x1   :  { %8 = vsyncpa [#allocation6], 0 }
   0x2   :  { %9 = vsyncpa [#allocation4], 0  ;;  %s377_s9 = smov [#allocation2]   ;;  %s378_s11 = smov [#allocation5]  }
   0x3   :  { %s16_s10 = sshll.u32 %s377_s9, 4  ;;  %s25_s12 = sshll.u32 %s378_s11, 4  ;;  %s17_s10 = int_to_ptr.vmem [resolvable:$true] %s16_s10  ;;  %s398_s12 = int_to_ptr.vmem [resolvable:$true] %s25_s12 }
   0x4   :  { %s305_s15 = scalar_lea.hbm %s441_s0, 128 }
   0x5   :  { %p306_p0 = scmp.ne.s32.totalorder %s441_s0, %s305_s15  ;;  %p309_p1 = scmp.lt.u32.totalorder %s305_s15, %s441_s0 }
   0x7   :  { %p311_p2 = pnand %p309_p1, %p306_p0 }
   0x9   :  { %314 = shalt.err (!%p311_p2)
}
   0xa   :  { %s315_s20 = scalar_lea.vmem %s17_s10, 128  ;;  %p320_p4 = scmp.lt.s32.totalorder %s17_s10, %s17_s10 }
   0xb   :  { %p316_p3 = scmp.ne.s32.totalorder %s17_s10, %s315_s20  ;;  %p321_p5 = scmp.lt.s32.totalorder %s315_s20, %s315_s20 }
   0xd   :  { %p322_p6 = por %p321_p5, %p320_p4 }
   0xf   :  { %p323_p7 = pnand %p322_p6, %p316_p3 }
  0x11   :  { %326 = shalt.err (!%p323_p7)
}
  0x12   :  { %19 = dma.hbm_to_vmem [thread:$0]  %s441_s0, 128, %s17_s10, [#allocation3]  }
  0x13   :  { %s327_s25 = scalar_lea.hbm %s442_s1, 2560 }
  0x14   :  { %p328_p8 = scmp.ne.s32.totalorder %s442_s1, %s327_s25  ;;  %p331_p9 = scmp.lt.u32.totalorder %s327_s25, %s442_s1 }
  0x16   :  { %p333_p10 = pnand %p331_p9, %p328_p8 }
  0x18   :  { %336 = shalt.err (!%p333_p10)
}
  0x19   :  { %s337_s30 = scalar_lea.vmem %s398_s12, 2560  ;;  %p342_p12 = scmp.lt.s32.totalorder %s398_s12, %s398_s12 }
  0x1a   :  { %p338_p11 = scmp.ne.s32.totalorder %s398_s12, %s337_s30  ;;  %p343_p13 = scmp.lt.s32.totalorder %s337_s30, %s337_s30 }
  0x1c   :  { %p344_p0 = por %p343_p13, %p342_p12 }
  0x1e   :  { %p345_p1 = pnand %p344_p0, %p338_p11 }
  0x20   :  { %348 = shalt.err (!%p345_p1)
}
  0x21   :  { %s379_s0 = smov 512   ;;  %s380_s3 = smov 32  }
  0x22   :  { %31 = dma.hbm_to_vmem [thread:$0]  %s442_s1, 2560, %s398_s12, [#allocation6], %s379_s0, %s379_s0, %s380_s3  }
  0x23   :  { %371 = dma.done.wait [#allocation3], 128  }
  0x24   :  { %372 = vsyncadd [#allocation3], 4294967168 }
  0x25   :  { %373 = dma.done.wait [#allocation6], 2560  }
  0x26   :  { %374 = vsyncadd [#allocation6], 4294964736  ;;  %v381_v0 = vmov 0.0   ;;  %v40_v1 = vld [vmem:[#allocation5 + $0x8] sm:$0xff]  ;;  %v39_v3 = vld [vmem:[#allocation5] sm:$0xff]  ;;  %vm63_vm0 = vcmask 1043456  }
  0x27   :  { %140 = vmatprep.mubr.f32.mxu0 %v381_v0  ;;  %211 = vmatprep.mubr.f32.mxu1 %v381_v0  ;;  %v44_v2 = vld [vmem:[#allocation5 + $0x28] sm:$0xff]  ;;  %v43_v5 = vld [vmem:[#allocation5 + $0x20] sm:$0xff]  ;;  %v42_v6 = vld [vmem:[#allocation5 + $0x18] sm:$0xff]  ;;  %vm59_vm1 = vcmask 293888   ;;  %s382_s1 = smov [#allocation7]  }
  0x28   :  { %v279_v4 = vpack.c.bf16 %v44_v2, %v40_v1  ;;  %v46_v7 = vld [vmem:[#allocation5 + $0x38] sm:$0xff]  ;;  %v281_v8 = vpack.c.bf16 %v43_v5, %v39_v3  ;;  %v41_v10 = vld [vmem:[#allocation5 + $0x10] sm:$0xff]  ;;  %v48_v12 = vld [vmem:[#allocation5 + $0x48] sm:$0xff]  ;;  %s263_s6 = sshll.u32 %s382_s1, 4  ;;  %s264_s6 = int_to_ptr.vmem [resolvable:$true] %s263_s6 }
  0x29   :  { %v287_v9 = vpack.c.bf16 %v46_v7, %v42_v6  ;;  %v45_v11 = vld [vmem:[#allocation5 + $0x30] sm:$0xff]  ;;  %v52_v14 = vld [vmem:[#allocation5 + $0x68] sm:$0xff]  ;;  %v47_v15 = vld [vmem:[#allocation5 + $0x40] sm:$0xff]  ;;  %s349_s7 = scalar_lea.vmem %s264_s6, 512  ;;  %p354_p3 = scmp.lt.s32.totalorder %s264_s6, %s264_s6 }
  0x2a   :  { %280 = vmatprep.subr.bf16.mxu0 %v279_v4  ;;  %v289_v13 = vpack.c.bf16 %v45_v11, %v41_v10  ;;  %v51_v16 = vld [vmem:[#allocation5 + $0x60] sm:$0xff]  ;;  %v283_v17 = vpack.c.bf16 %v52_v14, %v48_v12  ;;  %v50_v19 = vld [vmem:[#allocation5 + $0x58] sm:$0xff]  ;;  %v49_v21 = vld [vmem:[#allocation5 + $0x50] sm:$0xff]  ;;  %p350_p2 = scmp.ne.s32.totalorder %s264_s6, %s349_s7  ;;  %p355_p4 = scmp.lt.s32.totalorder %s349_s7, %s349_s7 }
  0x2b   :  { %282 = vmatpush1.bf16.msra.mxu0 %v281_v8  ;;  %288 = vmatprep.subr.bf16.mxu1 %v287_v9  ;;  %v285_v18 = vpack.c.bf16 %v51_v16, %v47_v15  ;;  %v54_v20 = vld [vmem:[#allocation5 + $0x78] sm:$0xff]  ;;  %v53_v23 = vld [vmem:[#allocation5 + $0x70] sm:$0xff]  ;;  %v56_v25 = vld [vmem:[#allocation5 + $0x88] sm:$0xf] }
  0x2c   :  { %290 = vmatpush1.bf16.msra.mxu1 %v289_v13  ;;  %v291_v22 = vpack.c.bf16 %v54_v20, %v50_v19  ;;  %284 = vmatprep.subr.bf16.mxu0 %v283_v17  ;;  %v293_v24 = vpack.c.bf16 %v53_v23, %v49_v21  ;;  %v58_v26 = vld [vmem:[#allocation5 + $0x98] sm:$0xf]  ;;  %v55_v27 = vld [vmem:[#allocation5 + $0x80] sm:$0xf]  ;;  %v57_v29 = vld [vmem:[#allocation5 + $0x90] sm:$0xf]  ;;  %p356_p5 = por %p355_p4, %p354_p3 }
  0x2d   :  { %v38_v28 = vld [vmem:[#allocation2] sm:$0xff] }
  0x2e   :  { %292 = vmatprep.subr.bf16.mxu1 %v291_v22  ;;  %p357_p6 = pnand %p356_p5, %p350_p2 }
  0x2f   :  { %286 = vmatpush1.bf16.msra.mxu0 %v285_v18 }
  0x30   :  { %294 = vmatpush1.bf16.msra.mxu1 %v293_v24  ;;  %273 = vmatprep.subr.msk.mxu0 %vm63_vm0, %v56_v25 }
  0x31   :  { %276 = vmatprep.subr.msk.mxu1 %vm63_vm0, %v58_v26 }
  0x33   :  { %274 = vmatpush1.msk.msra.mxu0 %vm63_vm0, %v55_v27 }
  0x34   :  { %275 = vmatmul.mubr.msk.f32.vlgmr.msra.gmra.mrb[0].mxu0 %vm59_vm1, %v38_v28  ;;  %277 = vmatpush1.msk.msra.mxu1 %vm63_vm0, %v57_v29 }
  0x35   :  { %278 = vmatmul.mubr.msk.f32.vlgmr.msra.gmra.mrb[0].mxu1 %vm59_vm1, %v38_v28 }
 0x107   :  { %v142_v30 = vpop.f32.mrb[0].mxu0 }
 0x108   :  { %v144_v31 = vpop.f32.mrb[1].mxu0  ;;  %v213_v32 = vpop.f32.mrb[0].mxu1 }
 0x109   :  { %v218_v33 = vadd.f32 %v144_v31, %v142_v30  ;;  %v215_v34 = vpop.f32.mrb[1].mxu1 }
 0x10b   :  { %v219_v35 = vadd.f32 %v218_v33, %v213_v32 }
 0x10d   :  { %v220_v36 = vadd.f32 %v219_v35, %v215_v34 }
 0x10f   :  { %221 = vadd.xlane.f32.xlu0 %v220_v36 }
 0x19c   :  { %v222_v37 = vpop.xlane.xlu0 %221 }
 0x19d   :  { %v224_v38 = vmul.f32 0.001953125, %v222_v37 }
 0x19f   :  { %v225_v39 = vsub.f32 %v142_v30, %v224_v38  ;;  %v226_v40 = vsub.f32 %v144_v31, %v224_v38  ;;  %v227_v41 = vsub.f32 %v213_v32, %v224_v38  ;;  %v228_v42 = vsub.f32 %v215_v34, %v224_v38 }
 0x1a1   :  { %v229_v43 = vmul.f32 %v225_v39, %v225_v39  ;;  %v230_v44 = vmul.f32 %v226_v40, %v226_v40  ;;  %v231_v45 = vmul.f32 %v227_v41, %v227_v41  ;;  %v232_v47 = vmul.f32 %v228_v42, %v228_v42 }
 0x1a3   :  { %v233_v46 = vadd.f32 %v230_v44, %v229_v43 }
 0x1a5   :  { %v234_v48 = vadd.f32 %v233_v46, %v231_v45 }
 0x1a7   :  { %v235_v49 = vadd.f32 %v234_v48, %v232_v47 }
 0x1a9   :  { %236 = vadd.xlane.f32.xlu0 %v235_v49 }
 0x236   :  { %v237_v50 = vpop.xlane.xlu0 %236 }
 0x237   :  { %v238_v51 = vmul.f32 0.001953125, %v237_v50 }
 0x239   :  { %301 = vrsqrt.f32 %v238_v51  ;;  %vm241_vm2 = vcmp.eq.f32.partialorder %v238_v51, inf  ;;  %v244_v54 = vand.u32 2147483648, %v238_v51  ;;  %vm243_vm3 = vcmp.eq.f32.partialorder %v238_v51, 0.0 }
 0x243   :  { %v302_v52 = vpop.eup %301 }
 0x244   :  { %v240_v53 = vmul.f32 %v302_v52, %v238_v51 }
 0x246   :  { %v242_v55 = vsel %vm241_vm2, %v238_v51, %v240_v53 }
 0x247   :  { %v245_v56 = vsel %vm243_vm3, %v244_v54, %v242_v55 }
 0x248   :  { %v246_v57 = vadd.f32 1e-06, %v245_v56 }
 0x24a   :  { %303 = vrcp.f32 %v246_v57 }
 0x254   :  { %v304_v58 = vpop.eup %303 }
 0x255   :  { %v249_v59 = vmul.f32 %v304_v58, %v225_v39  ;;  %v250_v60 = vmul.f32 %v304_v58, %v226_v40  ;;  %v251_v61 = vmul.f32 %v304_v58, %v227_v41  ;;  %v252_v62 = vmul.f32 %v304_v58, %v228_v42 }
 0x257   :  { %253 = vst [vmem:[#allocation7] sm:$0xff] %v249_v59  ;;  %254 = vst [vmem:[#allocation7 + $0x8] sm:$0xff] %v250_v60 }
 0x258   :  { %255 = vst [vmem:[#allocation7 + $0x10] sm:$0xff] %v251_v61  ;;  %256 = vst [vmem:[#allocation7 + $0x18] sm:$0xff] %v252_v62 }
 0x259   :  { %360 = shalt.err (!%p357_p6)
}
 0x25a   :  { %s361_s10 = scalar_lea.hbm %s443_s2, 512 }
 0x25b   :  { %p362_p7 = scmp.ne.s32.totalorder %s443_s2, %s361_s10  ;;  %p365_p8 = scmp.lt.u32.totalorder %s361_s10, %s443_s2 }
 0x25d   :  { %p367_p9 = pnand %p365_p8, %p362_p7 }
 0x25f   :  { %370 = shalt.err (!%p367_p9)
}
 0x260   :  { %266 = dma.vmem_to_hbm [thread:$0]  %s264_s6, 512, %s443_s2, [#allocation4]  }
 0x261   :  { %375 = dma.done.wait [#allocation4], 512  }
 0x262   :  { %376 = vsyncadd [#allocation4], 4294966784 }
 0x263   :  { %270 = vsyncpa [#allocation3], 1 }
 0x264   :  { %271 = vsyncpa [#allocation6], 1 }
 0x265   :  { %272 = vsyncpa [#allocation4], 1 }

</bundles_post_ra>
